<compile_context>
chip_gen: v6e
topology: v6e:2x2x1
jax: 0.10.0
libtpu: 0.0.40
codegen_flags: <defaults>
</compile_context>

<pallas_src>
import functools

import jax
import jax.numpy as jnp
from jax import lax
from jax.experimental import pallas as pl
from jax.experimental.pallas import tpu as pltpu


# --------------------------------------------------------------------------- #
# Tiling helper: largest multiple of `base` that divides `dim` and is <= target,
# falling back to the full dim (keeps every block shape either a multiple of the
# hardware tile or equal to the full array dim).
# --------------------------------------------------------------------------- #
def _pick_tile(dim, target, base):
    if dim % base != 0:
        return dim
    t = min(target, dim)
    t -= t % base
    while t >= base:
        if dim % t == 0:
            return t
        t -= base
    return dim


# ------------------------------ linear kernel ------------------------------- #
def _linear_kernel(*refs, compute_dtype, has_bias, acc_in_out):
    if has_bias:
        x_ref, w_ref, b_ref, *rest = refs
    else:
        x_ref, w_ref, *rest = refs
        b_ref = None
    o_ref = rest[0]
    acc_ref = o_ref if acc_in_out else rest[1]

    @pl.when(pl.program_id(2) == 0)
    def _():
        acc_ref[...] = jnp.zeros_like(acc_ref)

    acc_ref[...] += jnp.dot(
        x_ref[...].astype(compute_dtype),
        w_ref[...].astype(compute_dtype),
        preferred_element_type=jnp.float32,
    )

    @pl.when(pl.program_id(2) == pl.num_programs(2) - 1)
    def _():
        acc = acc_ref[...]
        if b_ref is not None:
            acc = acc + b_ref[...].astype(jnp.float32)
        if (b_ref is not None) or (not acc_in_out):
            o_ref[...] = acc.astype(o_ref.dtype)


def linear(x2d, w, b=None, *, compute_dtype=jnp.bfloat16, out_dtype=jnp.float32,
           tm_target=512, tn_target=768, tk_target=512):
    """Tiled y = x @ w (+ b).  x:(M,Cin), w:(Cin,Cout), b:(Cout,) or None."""
    M, Cin = x2d.shape
    Cout = w.shape[1]
    out_dtype = jnp.dtype(out_dtype)
    acc_in_out = out_dtype == jnp.dtype(jnp.float32)   # f32 out -> no scratch

    # bf16 operands/outputs pack 16 rows per sublane tile.
    sub = 16 if (jnp.dtype(x2d.dtype).itemsize == 2 or out_dtype.itemsize == 2) else 8
    tm = _pick_tile(M, tm_target, sub)
    tn = _pick_tile(Cout, tn_target, 128)
    tk = _pick_tile(Cin, tk_target, 128)
    grid = (M // tm, Cout // tn, Cin // tk)

    in_specs = [
        pl.BlockSpec((tm, tk), lambda i, j, k: (i, k)),
        pl.BlockSpec((tk, tn), lambda i, j, k: (k, j)),
    ]
    inputs = [x2d, w]
    if b is not None:
        in_specs.append(pl.BlockSpec((1, tn), lambda i, j, k: (0, j)))
        inputs.append(b.reshape(1, Cout))

    kernel = functools.partial(
        _linear_kernel, compute_dtype=compute_dtype,
        has_bias=b is not None, acc_in_out=acc_in_out)

    cost = pl.CostEstimate(
        flops=2 * M * Cin * Cout,
        transcendentals=0,
        bytes_accessed=(M * Cin * jnp.dtype(x2d.dtype).itemsize
                        + Cin * Cout * jnp.dtype(w.dtype).itemsize
                        + M * Cout * out_dtype.itemsize),
    )

    return pl.pallas_call(
        kernel,
        out_shape=jax.ShapeDtypeStruct((M, Cout), out_dtype),
        grid_spec=pltpu.PrefetchScalarGridSpec(
            num_scalar_prefetch=0,
            grid=grid,
            in_specs=in_specs,
            out_specs=pl.BlockSpec((tm, tn), lambda i, j, k: (i, j)),
            scratch_shapes=[] if acc_in_out else [pltpu.VMEM((tm, tn), jnp.float32)],
        ),
        compiler_params=pltpu.CompilerParams(
            dimension_semantics=("parallel", "parallel", "arbitrary")),
        cost_estimate=cost,
    )(*inputs)


# ----------------------------- attention kernels ----------------------------- #
def _mha_heads(q_ref, k_ref, v_ref, o_ref, *, heads, head_dim, compute_dtype,
               q_off=0, k_off=0, v_off=0):
    """Per-head attention.  Softmax scale is pre-folded into q (via w_qkv).

    Deferred normalization: o_h = (exp(s - max) @ v) * 1/rowsum, so the (N, N)
    probability matrix is never normalized on the VPU; each head is stored
    directly into o_ref (bounds live ranges -- no trailing concat).
    """
    for h in range(heads):
        lo = h * head_dim
        hi = lo + head_dim
        q = q_ref[:, q_off + lo:q_off + hi].astype(compute_dtype)
        k = k_ref[:, k_off + lo:k_off + hi].astype(compute_dtype)
        v = v_ref[:, v_off + lo:v_off + hi].astype(compute_dtype)

        # q @ k^T without materializing a transpose: contract last dims.
        s = lax.dot_general(q, k, (((1,), (1,)), ((), ())),
                            preferred_element_type=jnp.float32)
        s = s - jnp.max(s, axis=-1, keepdims=True)          # stable softmax (f32)
        p = jnp.exp(s)
        inv = pl.reciprocal(jnp.sum(p, axis=-1, keepdims=True), approx=True)
        o_h = jnp.dot(p.astype(compute_dtype), v, preferred_element_type=jnp.float32)
        o_ref[:, lo:hi] = (o_h * inv).astype(o_ref.dtype)


def _attn_grouped_kernel(q_ref, k_ref, v_ref, o_ref, *, heads, head_dim, compute_dtype):
    _mha_heads(q_ref, k_ref, v_ref, o_ref, heads=heads, head_dim=head_dim,
               compute_dtype=compute_dtype)


def _attn_slab_kernel(qkv_ref, o_ref, *, heads, head_dim, compute_dtype):
    C = heads * head_dim
    _mha_heads(qkv_ref, qkv_ref, qkv_ref, o_ref, heads=heads, head_dim=head_dim,
               compute_dtype=compute_dtype, q_off=0, k_off=C, v_off=2 * C)


def attention_core(qkv3d, num_heads, *, compute_dtype=jnp.bfloat16,
                   out_dtype=jnp.bfloat16):
    """qkv3d: (B, N, 3C)  ->  (B, N, C) attention output (head-concat layout)."""
    B, N, C3 = qkv3d.shape
    C = C3 // 3
    hd = C // num_heads

    # Head-group width: pack heads into 128-lane column blocks when possible.
    gw = None
    if hd % 128 == 0:
        gw = hd
    elif (128 % hd == 0) and (C % 128 == 0):
        gw = 128

    in_b = jnp.dtype(qkv3d.dtype).itemsize
    out_b = jnp.dtype(out_dtype).itemsize
    cost = pl.CostEstimate(
        flops=4 * B * num_heads * N * N * hd,
        transcendentals=B * num_heads * N * N,
        bytes_accessed=B * N * (C3 * in_b + C * out_b),
    )

    if gw is not None:
        hg = gw // hd                      # heads per group
        c_blk = C // gw                    # column-block index of the k/v parts
        grid = (B, c_blk)
        in_specs = [
            pl.BlockSpec((pl.Squeezed(), N, gw), lambda b, g: (b, 0, g)),
            pl.BlockSpec((pl.Squeezed(), N, gw), lambda b, g: (b, 0, c_blk + g)),
            pl.BlockSpec((pl.Squeezed(), N, gw), lambda b, g: (b, 0, 2 * c_blk + g)),
        ]
        out_specs = pl.BlockSpec((pl.Squeezed(), N, gw), lambda b, g: (b, 0, g))
        kernel = functools.partial(_attn_grouped_kernel, heads=hg, head_dim=hd,
                                   compute_dtype=compute_dtype)
        args = (qkv3d, qkv3d, qkv3d)       # same slab, three column windows
        sems = ("parallel", "parallel")
        per_step = (2 * (3 * N * gw * in_b + N * gw * out_b)
                    + hg * (2 * N * N * 4 + 4 * N * gw * 4))
    else:
        grid = (B,)
        in_specs = [pl.BlockSpec((pl.Squeezed(), N, C3), lambda b: (b, 0, 0))]
        out_specs = pl.BlockSpec((pl.Squeezed(), N, C), lambda b: (b, 0, 0))
        kernel = functools.partial(_attn_slab_kernel, heads=num_heads, head_dim=hd,
                                   compute_dtype=compute_dtype)
        args = (qkv3d,)
        sems = ("parallel",)
        per_step = (2 * (N * C3 * in_b + N * C * out_b)
                    + 2 * N * N * 4 + 4 * N * C * 4)

    # Explicit VMEM budget: >= the 32 MiB default, generously above the per-step
    # estimate, and safely below v7x's 64 MiB physical VMEM.
    vmem_limit = int(min(max(2 * per_step, 32 * 1024 * 1024), 48 * 1024 * 1024))

    return pl.pallas_call(
        kernel,
        out_shape=jax.ShapeDtypeStruct((B, N, C), out_dtype),
        grid_spec=pltpu.PrefetchScalarGridSpec(
            num_scalar_prefetch=0,
            grid=grid,
            in_specs=in_specs,
            out_specs=out_specs,
        ),
        compiler_params=pltpu.CompilerParams(
            dimension_semantics=sems, vmem_limit_bytes=vmem_limit),
        cost_estimate=cost,
    )(*args)


# ------------------------------- full module --------------------------------- #
def attention_forward(x, params, num_heads, *, compute_dtype=jnp.bfloat16,
                      storage_dtype=jnp.bfloat16):
    """PaSST Attention.forward.  attn_drop / proj_drop are identity (p=0, eval)."""
    B, N, C = x.shape
    hd = C // num_heads
    scale = hd ** (-0.5)

    # Fold the softmax scale into the q-columns of w_qkv / b_qkv at trace time.
    w_qkv = params["w_qkv"]
    w_qkv = jnp.concatenate([w_qkv[:, :C] * scale, w_qkv[:, C:]], axis=1)
    b_qkv = params.get("b_qkv")
    if b_qkv is not None:
        b_qkv = jnp.concatenate([b_qkv[:C] * scale, b_qkv[C:]])

    x2d = x.reshape(B * N, C)

    # 1) qkv projection; intermediate stored as storage_dtype (bf16 by default).
    qkv = linear(x2d, w_qkv, b_qkv, compute_dtype=compute_dtype,
                 out_dtype=storage_dtype)                        # (B*N, 3C)
    qkv3d = qkv.reshape(B, N, 3 * C)                             # free reshape

    # 2) attention (attn_drop identity); output already in (B, N, C)
    # head-concat layout -> no transpose / HBM copy before the proj.
    o = attention_core(qkv3d, num_heads, compute_dtype=compute_dtype,
                       out_dtype=storage_dtype)

    # 3) output projection (proj_drop identity), back to the input dtype.
    out = linear(o.reshape(B * N, C), params["w_proj"], params["b_proj"],
                 compute_dtype=compute_dtype, out_dtype=x.dtype)
    return out.reshape(B, N, C)


def init_params(key, dim):
    k1, k2, k3, k4 = jax.random.split(key, 4)
    # Deterministic synthetic weights; stored as (in, out) so forward is x @ W.
    # qkv_bias=True (PaSST default) -> b_qkv included.
    w_qkv = jax.random.normal(k1, (dim, 3 * dim), jnp.float32) * 0.02
    b_qkv = jax.random.normal(k2, (3 * dim,), jnp.float32) * 0.02
    w_proj = jax.random.normal(k3, (dim, dim), jnp.float32) * 0.02
    b_proj = jax.random.normal(k4, (dim,), jnp.float32) * 0.02
    return dict(w_qkv=w_qkv, b_qkv=b_qkv, w_proj=w_proj, b_proj=b_proj)


def reference_forward(x, params, num_heads):
    # Pure-JAX reference mirroring the PyTorch forward, for validation.
    B, N, C = x.shape
    hd = C // num_heads
    scale = hd ** (-0.5)
    qkv = x @ params["w_qkv"]
    if params.get("b_qkv") is not None:
        qkv = qkv + params["b_qkv"]
    qkv = qkv.reshape(B, N, 3, num_heads, hd).transpose(2, 0, 3, 1, 4)
    q, k, v = qkv[0], qkv[1], qkv[2]
    attn = jnp.einsum("bhnd,bhmd->bhnm", q, k) * scale
    attn = jax.nn.softmax(attn, axis=-1)
    o = jnp.einsum("bhnm,bhmd->bhnd", attn, v)
    o = o.transpose(0, 2, 1, 3).reshape(B, N, C)
    return o @ params["w_proj"] + params["b_proj"]


if __name__ == "__main__":
    key = jax.random.PRNGKey(0)
    kx, kp, kx2, kp2 = jax.random.split(key, 4)

    # Case 1: tiny dims -> per-batch slab attention path (C not 128-aligned).
    B, N, C, H = 2, 8, 32, 8   # head_dim = 4
    x = jax.random.normal(kx, (B, N, C), jnp.float32)
    params = init_params(kp, C)
    ref = reference_forward(x, params, H)

    # Default fast path: bf16 at the MXU, bf16 intermediates, f32 accumulation.
    out = jax.block_until_ready(attention_forward(x, params, H))
    assert out.shape == (B, N, C)
    assert jnp.allclose(out, ref, atol=5e-2, rtol=5e-2), "bf16 path mismatch"

    # f32-everywhere path (tight check; approx reciprocal slightly loosens it).
    out32 = jax.block_until_ready(
        attention_forward(x, params, H, compute_dtype=jnp.float32,
                          storage_dtype=jnp.float32))
    assert jnp.allclose(out32, ref, atol=3e-3, rtol=3e-3), "f32 path mismatch"

    # Case 2: 128-lane head-group attention path (C % 128 == 0, head_dim = 64).
    B2, N2, C2, H2 = 2, 16, 256, 4
    x2 = jax.random.normal(kx2, (B2, N2, C2), jnp.float32)
    params2 = init_params(kp2, C2)
    ref2 = reference_forward(x2, params2, H2)
    out2 = jax.block_until_ready(attention_forward(x2, params2, H2))
    assert out2.shape == (B2, N2, C2)
    assert jnp.allclose(out2, ref2, atol=5e-2, rtol=5e-2), "head-group path mismatch"

    print("KERNEL_OK")
</pallas_src>

<mosaic_0001>
module attributes {stable_mosaic.version = 11 : i64} {
  func.func @_linear_kernel(%arg0: i32, %arg1: i32, %arg2: i32, %arg3: memref<16x32xf32, #tpu.memory_space<vmem>>, %arg4: memref<32x96xf32, #tpu.memory_space<vmem>>, %arg5: memref<1x96xf32, #tpu.memory_space<vmem>>, %arg6: memref<16x96xbf16, #tpu.memory_space<vmem>>, %arg7: memref<16x96xf32, #tpu.memory_space<vmem>>) attributes {dimension_semantics = [#tpu.dimension_semantics<parallel>, #tpu.dimension_semantics<parallel>, #tpu.dimension_semantics<arbitrary>], iteration_bounds = array<i64: 1, 1, 1>, scalar_prefetch = 0 : i64, scratch_operands = 1 : i64, tpu.core_type = #tpu.core_type<tc>, window_params = [{transform_indices = @transform_0, window_bounds = array<i64: 16, 32>}, {transform_indices = @transform_1, window_bounds = array<i64: 32, 96>}, {transform_indices = @transform_2, window_bounds = array<i64: 1, 96>}, {transform_indices = @transform_3, window_bounds = array<i64: 16, 96>}]} {
    %c0_i32 = arith.constant 0 : i32
    %0 = arith.cmpi eq, %arg2, %c0_i32 : i32
    %1 = arith.extui %0 : i1 to i32
    %c0_i32_0 = arith.constant 0 : i32
    %2 = arith.cmpi ne, %1, %c0_i32_0 : i32
    scf.if %2 {
      %cst_10 = arith.constant 0.000000e+00 : f32
      %14 = vector.broadcast %cst_10 : f32 to vector<16x96xf32>
      %c0_11 = arith.constant 0 : index
      %c0_12 = arith.constant 0 : index
      %15 = vector.load %arg7[%c0_11, %c0_12] : memref<16x96xf32, #tpu.memory_space<vmem>>, vector<16x96xf32>
      tpu.vector_store %arg7[%c0_11, %c0_12], %14 {strides = array<i32>} : memref<16x96xf32, #tpu.memory_space<vmem>>, vector<16x96xf32>,
    } else {
    }
    %c0 = arith.constant 0 : index
    %c0_1 = arith.constant 0 : index
    %3 = vector.load %arg7[%c0, %c0_1] : memref<16x96xf32, #tpu.memory_space<vmem>>, vector<16x96xf32>
    %c0_2 = arith.constant 0 : index
    %c0_3 = arith.constant 0 : index
    %4 = vector.load %arg3[%c0_2, %c0_3] : memref<16x32xf32, #tpu.memory_space<vmem>>, vector<16x32xf32>
    %5 = arith.truncf %4 : vector<16x32xf32> to vector<16x32xbf16>
    %c0_4 = arith.constant 0 : index
    %c0_5 = arith.constant 0 : index
    %6 = vector.load %arg4[%c0_4, %c0_5] : memref<32x96xf32, #tpu.memory_space<vmem>>, vector<32x96xf32>
    %7 = arith.truncf %6 : vector<32x96xf32> to vector<32x96xbf16>
    %cst = arith.constant dense<0.000000e+00> : vector<16x96xf32>
    %8 = tpu.matmul %5, %7, %cst {dimension_numbers = #tpu.dot_dimension_numbers<[1], [0], [0], [1], [0, 0, 1, 1], [], []>} : vector<16x32xbf16>, vector<32x96xbf16>, vector<16x96xf32> -> vector<16x96xf32>
    %9 = arith.addf %3, %8 : vector<16x96xf32>
    %c0_6 = arith.constant 0 : index
    %c0_7 = arith.constant 0 : index
    %10 = vector.load %arg7[%c0_6, %c0_7] : memref<16x96xf32, #tpu.memory_space<vmem>>, vector<16x96xf32>
    tpu.vector_store %arg7[%c0_6, %c0_7], %9 {strides = array<i32>} : memref<16x96xf32, #tpu.memory_space<vmem>>, vector<16x96xf32>,
    %c0_i32_8 = arith.constant 0 : i32
    %11 = arith.cmpi eq, %arg2, %c0_i32_8 : i32
    %12 = arith.extui %11 : i1 to i32
    %c0_i32_9 = arith.constant 0 : i32
    %13 = arith.cmpi ne, %12, %c0_i32_9 : i32
    scf.if %13 {
      %c0_10 = arith.constant 0 : index
      %c0_11 = arith.constant 0 : index
      %14 = vector.load %arg7[%c0_10, %c0_11] : memref<16x96xf32, #tpu.memory_space<vmem>>, vector<16x96xf32>
      %c0_12 = arith.constant 0 : index
      %c0_13 = arith.constant 0 : index
      %15 = vector.load %arg5[%c0_12, %c0_13] : memref<1x96xf32, #tpu.memory_space<vmem>>, vector<1x96xf32>
      %16 = vector.broadcast %15 : vector<1x96xf32> to vector<16x96xf32>
      %17 = arith.addf %14, %16 : vector<16x96xf32>
      %18 = arith.truncf %17 : vector<16x96xf32> to vector<16x96xbf16>
      %c0_14 = arith.constant 0 : index
      %c0_15 = arith.constant 0 : index
      %19 = vector.load %arg6[%c0_14, %c0_15] : memref<16x96xbf16, #tpu.memory_space<vmem>>, vector<16x96xbf16>
      tpu.vector_store %arg6[%c0_14, %c0_15], %18 {strides = array<i32>} : memref<16x96xbf16, #tpu.memory_space<vmem>>, vector<16x96xbf16>,
    } else {
    }
    return
  }
  func.func @transform_0(%arg0: i32, %arg1: i32, %arg2: i32) -> (i32, i32) {
    %c0_i32 = arith.constant 0 : i32
    return %arg0, %arg2 : i32, i32
  }
  func.func @transform_1(%arg0: i32, %arg1: i32, %arg2: i32) -> (i32, i32) {
    %c0_i32 = arith.constant 0 : i32
    return %arg2, %arg1 : i32, i32
  }
  func.func @transform_2(%arg0: i32, %arg1: i32, %arg2: i32) -> (i32, i32) {
    %c0_i32 = arith.constant 0 : i32
    %c0_i32_0 = arith.constant 0 : i32
    return %c0_i32, %arg1 : i32, i32
  }
  func.func @transform_3(%arg0: i32, %arg1: i32, %arg2: i32) -> (i32, i32) {
    %c0_i32 = arith.constant 0 : i32
    return %arg0, %arg1 : i32, i32
  }
}

</mosaic_0001>

<bundles_post_ra>
// kernel: tpu_custom_call.1
= control target key start
LH: loop header
LB: loop body
LE: loop exit
PB: predicated region body
PF: predicated region fallthrough
CT: control target
= control target key end

     0   :  { %8 = vsyncpa [#allocation4], 0  ;;  %s292_s0 = inlined_call_operand.hbm [shape: f32[16,32], index: 0, kind: input, shape index: {}]   ;;  %s293_s1 = inlined_call_operand.hbm [shape: f32[32,96], index: 1, kind: input, shape index: {}]   ;;  %s294_s2 = inlined_call_operand.vmem [shape: f32[1,96], index: 2, kind: input, shape index: {}]   ;;  %s295_s3 = inlined_call_operand.hbm [shape: bf16[16,96], index: 3, kind: output, shape index: {}]  }
   0x1   :  { %9 = vsyncpa [#allocation7], 0 }
   0x2   :  { %10 = vsyncpa [#allocation5], 0  ;;  %s247_s12 = smov [#allocation3]  }
   0x3   :  { %s16_s13 = sshll.u32 %s247_s12, 4  ;;  %s17_s13 = int_to_ptr.vmem [resolvable:$true] %s16_s13 }
   0x4   :  { %s189_s14 = scalar_lea.vmem %s17_s13, 256  ;;  %p194_p1 = scmp.lt.s32.totalorder %s17_s13, %s17_s13 }
   0x5   :  { %p190_p0 = scmp.ne.s32.totalorder %s17_s13, %s189_s14  ;;  %p195_p2 = scmp.lt.s32.totalorder %s189_s14, %s189_s14 }
   0x7   :  { %p196_p3 = por %p195_p2, %p194_p1 }
   0x9   :  { %p197_p4 = pnand %p196_p3, %p190_p0 }
   0xb   :  { %200 = shalt.err (!%p197_p4)
}
   0xc   :  { %s248_s15 = smov 128   ;;  %s249_s16 = smov 8  }
   0xd   :  { %22 = dma.hbm_to_vmem [thread:$0]  %s292_s0, 256, %s17_s13, [#allocation4], %s248_s15, %s248_s15, %s249_s16  }
   0xe   :  { %s250_s19 = smov [#allocation6]  }
   0xf   :  { %s28_s20 = sshll.u32 %s250_s19, 4  ;;  %s29_s20 = int_to_ptr.vmem [resolvable:$true] %s28_s20 }
  0x10   :  { %s209_s21 = scalar_lea.vmem %s29_s20, 512  ;;  %p214_p6 = scmp.lt.s32.totalorder %s29_s20, %s29_s20 }
  0x11   :  { %p210_p5 = scmp.ne.s32.totalorder %s29_s20, %s209_s21  ;;  %p215_p7 = scmp.lt.s32.totalorder %s209_s21, %s209_s21 }
  0x13   :  { %p216_p8 = por %p215_p7, %p214_p6 }
  0x15   :  { %p217_p9 = pnand %p216_p8, %p210_p5 }
  0x17   :  { %220 = shalt.err (!%p217_p9)
}
  0x18   :  { %34 = dma.hbm_to_vmem [thread:$0]  %s293_s1, 512, %s29_s20, [#allocation7], %s248_s15, %s248_s15, %s249_s16  }
  0x19   :  { %241 = dma.done.wait [#allocation4], 256  }
  0x1a   :  { %242 = vsyncadd [#allocation4], 4294967040 }
  0x1b   :  { %243 = dma.done.wait [#allocation7], 512  }
  0x1c   :  { %244 = vsyncadd [#allocation7], 4294966784  ;;  %vm48_vm0 = vcmask 785408   ;;  %v251_v0 = vmov 0.0   ;;  %vm252_vm1 = vmmov 0   ;;  %v58_v1 = vld [vmem:[#allocation6 + $0x10] sm:$0xff] }
  0x1d   :  { %49 = vst.msk [vmem:[#allocation2] sm:$0xff] %vm48_vm0, %v251_v0  ;;  %50 = vst.msk [vmem:[#allocation2 + $0x8] sm:$0xff] %vm48_vm0, %v251_v0  ;;  %164 = vmatprep.subr.bf16.mxu0 %v251_v0  ;;  %168 = vmatprep.mubr.msk.bf16.mxu0 %vm252_vm1, %v251_v0  ;;  %v59_v2 = vld [vmem:[#allocation6 + $0x18] sm:$0xff]  ;;  %v56_v3 = vld [vmem:[#allocation6] sm:$0xff]  ;;  %vm62_vm2 = vcmask 261120   ;;  %vm134_vm3 = vcmask 781312  }
  0x1e   :  { %v61_v4 = vpack.c.bf16 %v59_v2, %v58_v1  ;;  %v57_v5 = vld [vmem:[#allocation6 + $0x8] sm:$0xff]  ;;  %v53_v7 = vld [vmem:[#allocation3] sm:$0xff]  ;;  %v54_v8 = vld [vmem:[#allocation3 + $0x8] sm:$0xff]  ;;  %s253_s24 = smov [#allocation8]  }
  0x1f   :  { %v60_v6 = vpack.c.bf16 %v57_v5, %v56_v3  ;;  %v55_v9 = vpack.c.bf16 %v54_v8, %v53_v7  ;;  %v156_v18 = vld [vmem:[%s294_s2] ss:$0 sm:$0xff]  ;;  %s142_s25 = sshll.u32 %s253_s24, 4  ;;  %s143_s25 = int_to_ptr.vmem [resolvable:$true] %s142_s25 }
  0x20   :  { %165 = vmatpush3.bf16.msra.mxu0 %v61_v4  ;;  %s221_s26 = scalar_lea.vmem %s143_s25, 128  ;;  %p226_p11 = scmp.lt.s32.totalorder %s143_s25, %s143_s25 }
  0x21   :  { %166 = vmatprep.subr.bf16.mxu0 %v251_v0  ;;  %p222_p10 = scmp.ne.s32.totalorder %s143_s25, %s221_s26  ;;  %p227_p12 = scmp.lt.s32.totalorder %s221_s26, %s221_s26 }
  0x23   :  { %p228_p13 = por %p227_p12, %p226_p11 }
  0x24   :  { %167 = vmatpush3.bf16.msra.mxu0 %v60_v6  ;;  %v51_v10 = vld [vmem:[#allocation2] sm:$0xff]  ;;  %v52_v14 = vld [vmem:[#allocation2 + $0x8] sm:$0xff] }
  0x25   :  { %p229_p0 = pnand %p228_p13, %p222_p10 }
  0x27   :  { %169 = vmatmul.mubr.msk.bf16.vlgmr.msra.gmra.mxu0 %vm62_vm2, %v55_v9 }
  0xe7   :  { %v100_v11 = vpop.f32.mrf.mxu0 }
  0xe8   :  { %v107_v12 = vadd.f32 %v100_v11, %v51_v10 }
  0xe9   :  { %v170_v13 = vpop.f32.mrf.mxu0 }
  0xea   :  { %110 = vst.msk [vmem:[#allocation2] sm:$0xff] %vm48_vm0, %v107_v12 }
  0xeb   :  { %v103_v15 = vpop.f32.mrf.mxu0 }
  0xec   :  { %v108_v16 = vadd.f32 %v103_v15, %v52_v14 }
  0xed   :  { %v171_v17 = vpop.f32.mrf.mxu0 }
  0xee   :  { %111 = vst.msk [vmem:[#allocation2 + $0x8] sm:$0xff] %vm48_vm0, %v108_v16 }
  0xf1   :  { %v115_v19 = vld [vmem:[#allocation2] sm:$0xff] }
  0xf2   :  { %v124_v20 = vadd.f32 %v156_v18, %v115_v19 }
  0xf4   :  { %v159_v21 = vpack.c.bf16 %v124_v20, %v124_v20 }
  0xf5   :  { %v116_v22 = vld [vmem:[#allocation2 + $0x8] sm:$0xff] }
  0xf6   :  { %v125_v23 = vadd.f32 %v156_v18, %v116_v22  ;;  %135 = vst.msk [vmem:[#allocation8] sm:$0xf] %vm134_vm3, %v159_v21 }
  0xf8   :  { %v160_v24 = vpack.c.bf16 %v125_v23, %v125_v23 }
  0xfa   :  { %136 = vst.msk [vmem:[#allocation8 + $0x4] sm:$0xf] %vm134_vm3, %v160_v24 }
  0xfb   :  { %232 = shalt.err (!%p229_p0)
}
  0xfc   :  { %s254_s2 = smov 64   ;;  %s255_s27 = smov 4  }
  0xfd   :  { %148 = dma.vmem_to_hbm [thread:$0]  %s143_s25, 128, %s295_s3, [#allocation5], %s254_s2, %s254_s2, %s255_s27  }
  0xfe   :  { %245 = dma.done.wait [#allocation5], 128  }
  0xff   :  { %246 = vsyncadd [#allocation5], 4294967168 }
 0x100   :  { %152 = vsyncpa [#allocation4], 1 }
 0x101   :  { %153 = vsyncpa [#allocation7], 1 }
 0x102   :  { %154 = vsyncpa [#allocation5], 1 }

</bundles_post_ra>
